<compile_context>
chip_gen: v7x
topology: tpu7x:2x2x1
jax: 0.10.0
libtpu: 0.0.40
codegen_flags: <defaults>
</compile_context>

<pallas_src>
import functools

import jax
import jax.numpy as jnp
from jax.experimental import pallas as pl
from jax.experimental.pallas import tpu as pltpu


def _round_up(x, m):
    return (x + m - 1) // m * m


def _dropout_keep_mask(shape, seed_u32, salt):
    """Counter-based hash PRNG -> per-element keep mask with P(keep) = 0.5.

    Uses only 32-bit integer VPU ops, so it lowers on TPU (Mosaic) and in
    interpret mode alike. seed_u32 must already fold in the grid step so tiles
    get independent masks.
    """
    rows = jax.lax.broadcasted_iota(jnp.int32, shape, 0)
    cols = jax.lax.broadcasted_iota(jnp.int32, shape, 1)
    idx = (rows * shape[1] + cols).astype(jnp.uint32)
    x = idx + seed_u32 + jnp.uint32(salt)
    # wang/murmur-style finalizer mixing
    x = x ^ (x >> 16)
    x = x * jnp.uint32(0x7FEB352D)
    x = x ^ (x >> 15)
    x = x * jnp.uint32(0x846CA68B)
    x = x ^ (x >> 16)
    return (x >> 31) == 0          # top bit -> keep probability exactly 0.5


def prenet_kernel(seed_ref, x_ref, w1_ref, b1_ref, w2_ref, b2_ref, o_ref):
    # Per-tile seed: fold the grid step in so dropout masks differ per tile
    # (and per core when the row axis is megacore-parallel).
    pid = pl.program_id(0).astype(jnp.uint32)
    tile_seed = seed_ref[0].astype(jnp.uint32) + (pid + jnp.uint32(1)) * jnp.uint32(0x9E3779B1)

    # ---- layer 1: linear (bf16 MXU operands, f32 acc) -> relu -> dropout(0.5) ----
    h = jnp.dot(x_ref[...], w1_ref[...], preferred_element_type=jnp.float32)
    h = h + b1_ref[...]                      # (tile_n, H) + (1, H) broadcast, f32
    h = jnp.maximum(h, 0.0)                  # relu
    keep1 = _dropout_keep_mask(h.shape, tile_seed, 0x85EBCA6B)
    h = jnp.where(keep1, h + h, 0.0)         # inverted dropout, scale 1/(1-p)=2

    # ---- layer 2: linear -> relu -> dropout(0.5) ----
    h = jnp.dot(h.astype(w2_ref.dtype), w2_ref[...],
                preferred_element_type=jnp.float32)
    h = h + b2_ref[...]
    h = jnp.maximum(h, 0.0)
    keep2 = _dropout_keep_mask(h.shape, tile_seed, 0xC2B2AE35)
    h = jnp.where(keep2, h + h, 0.0)

    o_ref[...] = h.astype(o_ref.dtype)


@functools.partial(jax.jit, static_argnames=("tile_n",))
def _prenet_forward_impl(seed, x, w1, b1, w2, b2, tile_n):
    N, num_mels = x.shape
    H = w1.shape[1]

    n_pad = _round_up(N, tile_n)
    if n_pad != N:
        x = jnp.pad(x, ((0, n_pad - N), (0, 0)))

    # bf16 operands for the MXU; elementwise math and the output stay f32.
    x_lp = x.astype(jnp.bfloat16)
    w1_lp = w1.astype(jnp.bfloat16)
    w2_lp = w2.astype(jnp.bfloat16)

    grid = (n_pad // tile_n,)

    grid_spec = pltpu.PrefetchScalarGridSpec(
        num_scalar_prefetch=1,          # seed -> SMEM, visible to index_maps
        grid=grid,
        in_specs=[
            pl.BlockSpec((tile_n, num_mels), lambda i, s: (i, 0)),
            pl.BlockSpec((num_mels, H),      lambda i, s: (0, 0)),  # VMEM-resident
            pl.BlockSpec((1, H),             lambda i, s: (0, 0)),
            pl.BlockSpec((H, H),             lambda i, s: (0, 0)),
            pl.BlockSpec((1, H),             lambda i, s: (0, 0)),
        ],
        out_specs=pl.BlockSpec((tile_n, H), lambda i, s: (i, 0)),
    )

    cost = pl.CostEstimate(
        flops=2 * n_pad * (num_mels * H + H * H),
        transcendentals=0,
        bytes_accessed=(n_pad * num_mels * 2          # x (bf16)
                        + num_mels * H * 2 + H * H * 2  # weights (bf16)
                        + 2 * H * 4                     # biases (f32)
                        + n_pad * H * 4),               # output (f32)
    )

    out = pl.pallas_call(
        prenet_kernel,
        out_shape=jax.ShapeDtypeStruct((n_pad, H), jnp.float32),
        grid_spec=grid_spec,
        compiler_params=pltpu.CompilerParams(
            dimension_semantics=("parallel",)),   # megacore split on v7x
        cost_estimate=cost,
    )(seed, x_lp, w1_lp, b1, w2_lp, b2)

    return out[:N]


def prenet_forward(seed, x, w1, b1, w2, b2, tile_n=512):
    """PreNet forward. x: [N, num_mels] f32; returns [N, hidden] f32."""
    N = x.shape[0]
    # Tile of up to `tile_n` rows (multiple of 8); shrink for tiny inputs.
    tile_n = min(tile_n, _round_up(N, 8))
    return _prenet_forward_impl(seed, x, w1, b1, w2, b2, tile_n)


def init_prenet_params(key, num_mels, hidden, layers=2, dtype=jnp.float32):
    """Parameter init mirroring the PyTorch module shapes.

    LinearNorm: xavier_normal_ (gain=1) on the weight; bias follows
    torch.nn.Linear's default uniform(-1/sqrt(fan_in), 1/sqrt(fan_in)).
    Weights are returned as [in_dim, out_dim] (transposed vs torch storage).
    """
    params = []
    in_dim = num_mels
    for _ in range(layers):
        key, kw, kb = jax.random.split(key, 3)
        std = (2.0 / (in_dim + hidden)) ** 0.5          # xavier normal, gain=1
        w = std * jax.random.normal(kw, (in_dim, hidden), dtype=dtype)
        bound = 1.0 / (in_dim ** 0.5)
        b = jax.random.uniform(kb, (1, hidden), dtype=dtype,
                               minval=-bound, maxval=bound)
        params.append((w, b))
        in_dim = hidden
    return params


if __name__ == "__main__":
    # Small shapes consistent with PreNet(num_mels, hidden, layers=2):
    batch, seq, num_mels, hidden = 2, 8, 80, 32
    N = batch * seq                      # flatten (batch, seq) -> N rows

    key = jax.random.PRNGKey(0)
    key, kx = jax.random.split(key)
    x = jax.random.normal(kx, (N, num_mels), dtype=jnp.float32)

    (w1, b1), (w2, b2) = init_prenet_params(key, num_mels, hidden, layers=2)

    seed = jnp.array([0], dtype=jnp.int32)   # dropout PRNG seed

    out = prenet_forward(seed, x, w1, b1, w2, b2)
    out = jax.block_until_ready(out)

    assert out.shape == (N, hidden)
    assert out.dtype == jnp.float32
    # Sanity: relu + dropout output is non-negative, and dropout zeroed ~half.
    assert bool(jnp.all(out >= 0.0))
    assert bool(jnp.any(out == 0.0))

    print("KERNEL_OK")
</pallas_src>

<mosaic_0001>
module attributes {stable_mosaic.version = 11 : i64} {
  func.func @prenet_kernel(%arg0: i32, %arg1: memref<1xi32, #tpu.memory_space<smem>>, %arg2: memref<16x80xbf16, #tpu.memory_space<vmem>>, %arg3: memref<80x32xbf16, #tpu.memory_space<vmem>>, %arg4: memref<1x32xf32, #tpu.memory_space<vmem>>, %arg5: memref<32x32xbf16, #tpu.memory_space<vmem>>, %arg6: memref<1x32xf32, #tpu.memory_space<vmem>>, %arg7: memref<16x32xf32, #tpu.memory_space<vmem>>) attributes {dimension_semantics = [#tpu.dimension_semantics<parallel>], iteration_bounds = array<i64: 1>, scalar_prefetch = 1 : i64, scratch_operands = 0 : i64, tpu.core_type = #tpu.core_type<tc>, window_params = [{transform_indices = @transform_0, window_bounds = array<i64: 16, 80>}, {pipeline_mode = #tpu.pipeline_mode<synchronous>, transform_indices = @transform_1, window_bounds = array<i64: 80, 32>}, {pipeline_mode = #tpu.pipeline_mode<synchronous>, transform_indices = @transform_2, window_bounds = array<i64: 1, 32>}, {pipeline_mode = #tpu.pipeline_mode<synchronous>, transform_indices = @transform_3, window_bounds = array<i64: 32, 32>}, {pipeline_mode = #tpu.pipeline_mode<synchronous>, transform_indices = @transform_4, window_bounds = array<i64: 1, 32>}, {transform_indices = @transform_5, window_bounds = array<i64: 16, 32>}]} {
    %c0 = arith.constant 0 : index
    %0 = memref.load %arg1[%c0] : memref<1xi32, #tpu.memory_space<smem>>
    %c1_i32 = arith.constant 1 : i32
    %1 = arith.addi %arg0, %c1_i32 : i32
    %c-1640531535_i32 = arith.constant -1640531535 : i32
    %2 = arith.muli %1, %c-1640531535_i32 : i32
    %3 = arith.addi %0, %2 : i32
    %c0_0 = arith.constant 0 : index
    %c0_1 = arith.constant 0 : index
    %4 = vector.load %arg2[%c0_0, %c0_1] : memref<16x80xbf16, #tpu.memory_space<vmem>>, vector<16x80xbf16>
    %c0_2 = arith.constant 0 : index
    %c0_3 = arith.constant 0 : index
    %5 = vector.load %arg3[%c0_2, %c0_3] : memref<80x32xbf16, #tpu.memory_space<vmem>>, vector<80x32xbf16>
    %cst = arith.constant dense<0.000000e+00> : vector<16x32xf32>
    %6 = tpu.matmul %4, %5, %cst {dimension_numbers = #tpu.dot_dimension_numbers<[1], [0], [0], [1], [0, 0, 1, 1], [], []>} : vector<16x80xbf16>, vector<80x32xbf16>, vector<16x32xf32> -> vector<16x32xf32>
    %c0_4 = arith.constant 0 : index
    %c0_5 = arith.constant 0 : index
    %7 = vector.load %arg4[%c0_4, %c0_5] : memref<1x32xf32, #tpu.memory_space<vmem>>, vector<1x32xf32>
    %8 = vector.broadcast %7 : vector<1x32xf32> to vector<16x32xf32>
    %9 = arith.addf %6, %8 : vector<16x32xf32>
    %cst_6 = arith.constant 0.000000e+00 : f32
    %10 = vector.broadcast %cst_6 : f32 to vector<16x32xf32>
    %11 = arith.maximumf %9, %10 : vector<16x32xf32>
    %12 = tpu.iota {dimensions = array<i32: 0>} : vector<16x32xi32>
    %13 = tpu.iota {dimensions = array<i32: 1>} : vector<16x32xi32>
    %c32_i32 = arith.constant 32 : i32
    %14 = vector.broadcast %c32_i32 : i32 to vector<16x32xi32>
    %15 = arith.muli %12, %14 : vector<16x32xi32>
    %16 = arith.addi %15, %13 : vector<16x32xi32>
    %17 = vector.broadcast %3 : i32 to vector<16x32xi32>
    %18 = arith.addi %16, %17 : vector<16x32xi32>
    %c-2048144789_i32 = arith.constant -2048144789 : i32
    %19 = vector.broadcast %c-2048144789_i32 : i32 to vector<16x32xi32>
    %20 = arith.addi %18, %19 : vector<16x32xi32>
    %c16_i32 = arith.constant 16 : i32
    %21 = vector.broadcast %c16_i32 : i32 to vector<16x32xi32>
    %22 = arith.shrui %20, %21 : vector<16x32xi32>
    %23 = arith.xori %20, %22 : vector<16x32xi32>
    %c2146121005_i32 = arith.constant 2146121005 : i32
    %24 = vector.broadcast %c2146121005_i32 : i32 to vector<16x32xi32>
    %25 = arith.muli %23, %24 : vector<16x32xi32>
    %c15_i32 = arith.constant 15 : i32
    %26 = vector.broadcast %c15_i32 : i32 to vector<16x32xi32>
    %27 = arith.shrui %25, %26 : vector<16x32xi32>
    %28 = arith.xori %25, %27 : vector<16x32xi32>
    %c-2073254261_i32 = arith.constant -2073254261 : i32
    %29 = vector.broadcast %c-2073254261_i32 : i32 to vector<16x32xi32>
    %30 = arith.muli %28, %29 : vector<16x32xi32>
    %c16_i32_7 = arith.constant 16 : i32
    %31 = vector.broadcast %c16_i32_7 : i32 to vector<16x32xi32>
    %32 = arith.shrui %30, %31 : vector<16x32xi32>
    %33 = arith.xori %30, %32 : vector<16x32xi32>
    %c31_i32 = arith.constant 31 : i32
    %34 = vector.broadcast %c31_i32 : i32 to vector<16x32xi32>
    %35 = arith.shrui %33, %34 : vector<16x32xi32>
    %c0_i32 = arith.constant 0 : i32
    %36 = vector.broadcast %c0_i32 : i32 to vector<16x32xi32>
    %37 = arith.cmpi eq, %35, %36 : vector<16x32xi32>
    %38 = arith.addf %11, %11 : vector<16x32xf32>
    %cst_8 = arith.constant 0.000000e+00 : f32
    %39 = vector.broadcast %cst_8 : f32 to vector<16x32xf32>
    %40 = arith.select %37, %38, %39 : vector<16x32xi1>, vector<16x32xf32>
    %41 = arith.truncf %40 : vector<16x32xf32> to vector<16x32xbf16>
    %c0_9 = arith.constant 0 : index
    %c0_10 = arith.constant 0 : index
    %42 = vector.load %arg5[%c0_9, %c0_10] : memref<32x32xbf16, #tpu.memory_space<vmem>>, vector<32x32xbf16>
    %cst_11 = arith.constant dense<0.000000e+00> : vector<16x32xf32>
    %43 = tpu.matmul %41, %42, %cst_11 {dimension_numbers = #tpu.dot_dimension_numbers<[1], [0], [0], [1], [0, 0, 1, 1], [], []>} : vector<16x32xbf16>, vector<32x32xbf16>, vector<16x32xf32> -> vector<16x32xf32>
    %c0_12 = arith.constant 0 : index
    %c0_13 = arith.constant 0 : index
    %44 = vector.load %arg6[%c0_12, %c0_13] : memref<1x32xf32, #tpu.memory_space<vmem>>, vector<1x32xf32>
    %45 = vector.broadcast %44 : vector<1x32xf32> to vector<16x32xf32>
    %46 = arith.addf %43, %45 : vector<16x32xf32>
    %cst_14 = arith.constant 0.000000e+00 : f32
    %47 = vector.broadcast %cst_14 : f32 to vector<16x32xf32>
    %48 = arith.maximumf %46, %47 : vector<16x32xf32>
    %49 = tpu.iota {dimensions = array<i32: 0>} : vector<16x32xi32>
    %50 = tpu.iota {dimensions = array<i32: 1>} : vector<16x32xi32>
    %c32_i32_15 = arith.constant 32 : i32
    %51 = vector.broadcast %c32_i32_15 : i32 to vector<16x32xi32>
    %52 = arith.muli %49, %51 : vector<16x32xi32>
    %53 = arith.addi %52, %50 : vector<16x32xi32>
    %54 = vector.broadcast %3 : i32 to vector<16x32xi32>
    %55 = arith.addi %53, %54 : vector<16x32xi32>
    %c-1028477387_i32 = arith.constant -1028477387 : i32
    %56 = vector.broadcast %c-1028477387_i32 : i32 to vector<16x32xi32>
    %57 = arith.addi %55, %56 : vector<16x32xi32>
    %c16_i32_16 = arith.constant 16 : i32
    %58 = vector.broadcast %c16_i32_16 : i32 to vector<16x32xi32>
    %59 = arith.shrui %57, %58 : vector<16x32xi32>
    %60 = arith.xori %57, %59 : vector<16x32xi32>
    %c2146121005_i32_17 = arith.constant 2146121005 : i32
    %61 = vector.broadcast %c2146121005_i32_17 : i32 to vector<16x32xi32>
    %62 = arith.muli %60, %61 : vector<16x32xi32>
    %c15_i32_18 = arith.constant 15 : i32
    %63 = vector.broadcast %c15_i32_18 : i32 to vector<16x32xi32>
    %64 = arith.shrui %62, %63 : vector<16x32xi32>
    %65 = arith.xori %62, %64 : vector<16x32xi32>
    %c-2073254261_i32_19 = arith.constant -2073254261 : i32
    %66 = vector.broadcast %c-2073254261_i32_19 : i32 to vector<16x32xi32>
    %67 = arith.muli %65, %66 : vector<16x32xi32>
    %c16_i32_20 = arith.constant 16 : i32
    %68 = vector.broadcast %c16_i32_20 : i32 to vector<16x32xi32>
    %69 = arith.shrui %67, %68 : vector<16x32xi32>
    %70 = arith.xori %67, %69 : vector<16x32xi32>
    %c31_i32_21 = arith.constant 31 : i32
    %71 = vector.broadcast %c31_i32_21 : i32 to vector<16x32xi32>
    %72 = arith.shrui %70, %71 : vector<16x32xi32>
    %c0_i32_22 = arith.constant 0 : i32
    %73 = vector.broadcast %c0_i32_22 : i32 to vector<16x32xi32>
    %74 = arith.cmpi eq, %72, %73 : vector<16x32xi32>
    %75 = arith.addf %48, %48 : vector<16x32xf32>
    %cst_23 = arith.constant 0.000000e+00 : f32
    %76 = vector.broadcast %cst_23 : f32 to vector<16x32xf32>
    %77 = arith.select %74, %75, %76 : vector<16x32xi1>, vector<16x32xf32>
    %c0_24 = arith.constant 0 : index
    %c0_25 = arith.constant 0 : index
    %78 = vector.load %arg7[%c0_24, %c0_25] : memref<16x32xf32, #tpu.memory_space<vmem>>, vector<16x32xf32>
    tpu.vector_store %arg7[%c0_24, %c0_25], %77 {strides = array<i32>} : memref<16x32xf32, #tpu.memory_space<vmem>>, vector<16x32xf32>,
    return
  }
  func.func @transform_0(%arg0: i32, %arg1: memref<1xi32, #tpu.memory_space<smem>>) -> (i32, i32) {
    %c0_i32 = arith.constant 0 : i32
    %c0_i32_0 = arith.constant 0 : i32
    return %arg0, %c0_i32 : i32, i32
  }
  func.func @transform_1(%arg0: i32, %arg1: memref<1xi32, #tpu.memory_space<smem>>) -> (i32, i32) {
    %c0_i32 = arith.constant 0 : i32
    %c0_i32_0 = arith.constant 0 : i32
    %c0_i32_1 = arith.constant 0 : i32
    return %c0_i32, %c0_i32_0 : i32, i32
  }
  func.func @transform_2(%arg0: i32, %arg1: memref<1xi32, #tpu.memory_space<smem>>) -> (i32, i32) {
    %c0_i32 = arith.constant 0 : i32
    %c0_i32_0 = arith.constant 0 : i32
    %c0_i32_1 = arith.constant 0 : i32
    return %c0_i32, %c0_i32_0 : i32, i32
  }
  func.func @transform_3(%arg0: i32, %arg1: memref<1xi32, #tpu.memory_space<smem>>) -> (i32, i32) {
    %c0_i32 = arith.constant 0 : i32
    %c0_i32_0 = arith.constant 0 : i32
    %c0_i32_1 = arith.constant 0 : i32
    return %c0_i32, %c0_i32_0 : i32, i32
  }
  func.func @transform_4(%arg0: i32, %arg1: memref<1xi32, #tpu.memory_space<smem>>) -> (i32, i32) {
    %c0_i32 = arith.constant 0 : i32
    %c0_i32_0 = arith.constant 0 : i32
    %c0_i32_1 = arith.constant 0 : i32
    return %c0_i32, %c0_i32_0 : i32, i32
  }
  func.func @transform_5(%arg0: i32, %arg1: memref<1xi32, #tpu.memory_space<smem>>) -> (i32, i32) {
    %c0_i32 = arith.constant 0 : i32
    %c0_i32_0 = arith.constant 0 : i32
    return %arg0, %c0_i32 : i32, i32
  }
}

</mosaic_0001>

<bundles_post_ra>
// kernel: _prenet_forward_impl.1
= control target key start
LH: loop header
LB: loop body
LE: loop exit
PB: predicated region body
PF: predicated region fallthrough
CT: control target
= control target key end

     0   :  { %v362_v1 = vmov 0.0   ;;  %vm363_vm0 = vmmov 0   ;;  %s450_s0 = inlined_call_operand.<no memory space> [shape: s32[1], index: 0, kind: input, shape index: {}]   ;;  %s451_s1 = inlined_call_operand.vmem [shape: bf16[16,80], index: 1, kind: input, shape index: {}]   ;;  %s452_s2 = inlined_call_operand.vmem [shape: bf16[80,32], index: 2, kind: input, shape index: {}]   ;;  %s453_s3 = inlined_call_operand.vmem [shape: f32[1,32], index: 3, kind: input, shape index: {}]   ;;  %s454_s4 = inlined_call_operand.vmem [shape: bf16[32,32], index: 4, kind: input, shape index: {}]   ;;  %s455_s5 = inlined_call_operand.vmem [shape: f32[1,32], index: 5, kind: input, shape index: {}]   ;;  %s456_s6 = inlined_call_operand.hbm [shape: f32[16,32], index: 6, kind: output, shape index: {}]  }
   0x1   :  { %v330_v0 = vld [vmem:[%s452_s2] sm:$0xff]   ;;  %303 = vmatprep.subr.bf16.mxu0 %v362_v1  ;;  %317 = vmatprep.subr.bf16.mxu1 %v362_v1  ;;  %v331_v2 = vld [vmem:[%s452_s2 + $0x8] sm:$0xff]   ;;  %v332_v3 = vld [vmem:[%s452_s2 + $0x10] sm:$0xff]  }
   0x2   :  { %304 = vmatpush3.bf16.msra.mxu0 %v330_v0  ;;  %313 = vmatprep.mubr.msk.bf16.mxu0 %vm363_vm0, %v362_v1 }
   0x3   :  { %305 = vmatprep.subr.bf16.mxu0 %v362_v1  ;;  %321 = vmatprep.mubr.msk.bf16.mxu1 %vm363_vm0, %v362_v1 }
   0x6   :  { %306 = vmatpush3.bf16.msra.mxu0 %v331_v2 }
   0x7   :  { %307 = vmatprep.subr.bf16.mxu0 %v362_v1 }
   0x8   :  { %12 = vsyncpa [#allocation5], 0  ;;  %v333_v4 = vld [vmem:[%s452_s2 + $0x18] sm:$0xff]   ;;  %v334_v5 = vld [vmem:[%s452_s2 + $0x20] sm:$0xff]   ;;  %vm82_vm1 = vcmask 654336   ;;  %v129_v9 = vlaneseq  ;;  %vm191_vm4 = vcmask 261120  }
   0x9   :  { %v335_v6 = vld [vmem:[%s451_s1] sm:$0xff]   ;;  %v337_v8 = vld [vmem:[%s454_s4 + $0x8] sm:$0xff]   ;;  %s27_s13 = sadd.s32 2654435761, %s450_s0  ;;  %s364_s15 = smov [#allocation4]  }
   0xa   :  { %308 = vmatpush3.bf16.msra.mxu0 %v332_v3  ;;  %v336_v7 = vld [vmem:[%s454_s4] sm:$0xff]   ;;  %v130_v10 = vshrl.u32 %v129_v9, 7  ;;  %v133_v12 = vand.u32 127, %v129_v9  ;;  %v138_v17 = vstv %s27_s13  ;;  %s271_s16 = sshll.u32 %s364_s15, 4  ;;  %s272_s16 = int_to_ptr.vmem [resolvable:$true] %s271_s16 }
   0xb   :  { %309 = vmatprep.subr.bf16.mxu0 %v362_v1  ;;  %318 = vmatpush3.bf16.msra.mxu1 %v336_v7  ;;  %v282_v36 = vld [vmem:[%s453_s3] ss:$0 sm:$0xff]  ;;  %p343_p1 = scmp.lt.s32.totalorder %s272_s16, %s272_s16 }
   0xc   :  { %319 = vmatprep.subr.bf16.mxu1 %v362_v1  ;;  %v131_v11 = vadd.s32 8, %v130_v10  ;;  %v134_v13 = vmul.u32 32, %v130_v10  ;;  %v290_v7 = vld [vmem:[%s455_s5] ss:$0 sm:$0xff]  ;;  %s338_s5 = scalar_lea.vmem %s272_s16, 256 }
   0xd   :  { %p339_p0 = scmp.ne.s32.totalorder %s272_s16, %s338_s5  ;;  %p344_p2 = scmp.lt.s32.totalorder %s338_s5, %s338_s5 }
   0xe   :  { %310 = vmatpush3.bf16.msra.mxu0 %v333_v4  ;;  %v135_v14 = vmul.u32 32, %v131_v11  ;;  %v136_v15 = vadd.s32 %v134_v13, %v133_v12 }
   0xf   :  { %311 = vmatprep.subr.bf16.mxu0 %v362_v1  ;;  %320 = vmatpush3.bf16.msra.mxu1 %v337_v8  ;;  %p345_p3 = por %p344_p2, %p343_p1 }
  0x10   :  { %v137_v16 = vadd.s32 %v135_v14, %v133_v12  ;;  %v139_v18 = vadd.s32 %v138_v17, %v136_v15 }
  0x11   :  { %p346_p4 = pnand %p345_p3, %p339_p0 }
  0x12   :  { %312 = vmatpush3.bf16.msra.mxu0 %v334_v5  ;;  %v140_v19 = vadd.s32 %v138_v17, %v137_v16  ;;  %v141_v20 = vadd.s32 2246822507, %v139_v18  ;;  %v238_v54 = vadd.s32 3266489909, %v139_v18 }
  0x14   :  { %v142_v21 = vadd.s32 2246822507, %v140_v19  ;;  %v143_v22 = vshrl.u32 %v141_v20, 16  ;;  %v239_v55 = vadd.s32 3266489909, %v140_v19  ;;  %v240_v56 = vshrl.u32 %v238_v54, 16 }
  0x15   :  { %314 = vmatmul.mubr.msk.bf16.vlgmr.msra.gmra.mrb[0].mxu0 %vm82_vm1, %v335_v6 }
  0x16   :  { %v144_v23 = vshrl.u32 %v142_v21, 16  ;;  %v145_v24 = vxor.u32 %v143_v22, %v141_v20  ;;  %v241_v57 = vshrl.u32 %v239_v55, 16  ;;  %v242_v58 = vxor.u32 %v240_v56, %v238_v54 }
  0x18   :  { %v146_v25 = vxor.u32 %v144_v23, %v142_v21  ;;  %v147_v26 = vmul.u32 2146121005, %v145_v24  ;;  %v243_v59 = vxor.u32 %v241_v57, %v239_v55  ;;  %v244_v60 = vmul.u32 2146121005, %v242_v58 }
  0x1a   :  { %v148_v27 = vmul.u32 2146121005, %v146_v25  ;;  %v149_v28 = vshrl.u32 %v147_v26, 15  ;;  %v245_v61 = vmul.u32 2146121005, %v243_v59  ;;  %v246_v62 = vshrl.u32 %v244_v60, 15 }
  0x1c   :  { %v150_v29 = vshrl.u32 %v148_v27, 15  ;;  %v151_v30 = vxor.u32 %v149_v28, %v147_v26  ;;  %v247_v63 = vshrl.u32 %v245_v61, 15  ;;  %v248_v0 = vxor.u32 %v246_v62, %v244_v60 }
  0x1e   :  { %v152_v31 = vxor.u32 %v150_v29, %v148_v27  ;;  %v153_v32 = vmul.u32 2221713035, %v151_v30  ;;  %v249_v1 = vxor.u32 %v247_v63, %v245_v61  ;;  %v250_v2 = vmul.u32 2221713035, %v248_v0 }
  0x20   :  { %v154_v33 = vmul.u32 2221713035, %v152_v31  ;;  %v155_v34 = vshrl.u32 %v153_v32, 16  ;;  %v251_v3 = vmul.u32 2221713035, %v249_v1  ;;  %v252_v4 = vshrl.u32 %v250_v2, 16 }
  0x22   :  { %v156_v35 = vshrl.u32 %v154_v33, 16  ;;  %v157_v37 = vxor.u32 %v155_v34, %v153_v32  ;;  %v253_v5 = vshrl.u32 %v251_v3, 16  ;;  %v254_v6 = vxor.u32 %v252_v4, %v250_v2 }
  0x24   :  { %v158_v38 = vxor.u32 %v156_v35, %v154_v33  ;;  %v159_v42 = vshrl.u32 %v157_v37, 31  ;;  %v255_v8 = vxor.u32 %v253_v5, %v251_v3  ;;  %v256_v10 = vshrl.u32 %v254_v6, 31 }
  0x26   :  { %v160_v44 = vshrl.u32 %v158_v38, 31  ;;  %vm161_vm2 = vcmp.eq.s32.totalorder %v159_v42, 0  ;;  %v257_v14 = vshrl.u32 %v255_v8, 31  ;;  %vm258_vm5 = vcmp.eq.s32.totalorder %v256_v10, 0 }
  0x28   :  { %vm162_vm3 = vcmp.eq.s32.totalorder %v160_v44, 0  ;;  %vm259_vm6 = vcmp.eq.s32.totalorder %v257_v14, 0 }
  0xe8   :  { %v120_v39 = vpop.f32.mrb[0].mxu0 }
  0xe9   :  { %v121_v40 = vadd.f32 %v282_v36, %v120_v39  ;;  %v315_v41 = vpop.f32.mrb[1].mxu0 }
  0xea   :  { %v123_v43 = vpop.f32.mrb[2].mxu0 }
  0xeb   :  { %v127_v45 = vmax.f32 %v121_v40, 0.0  ;;  %v124_v46 = vadd.f32 %v282_v36, %v123_v43  ;;  %v316_v47 = vpop.f32.mrb[3].mxu0 }
  0xed   :  { %v163_v48 = vadd.f32 %v127_v45, %v127_v45  ;;  %v128_v49 = vmax.f32 %v124_v46, 0.0 }
  0xef   :  { %v164_v50 = vadd.f32 %v128_v49, %v128_v49  ;;  %v165_v51 = vsel %vm161_vm2, %v163_v48, 0.0 }
  0xf1   :  { %v166_v52 = vsel %vm162_vm3, %v164_v50, 0.0 }
  0xf2   :  { %v167_v53 = vpack.c.bf16 %v166_v52, %v165_v51 }
  0xf4   :  { %322 = vmatmul.mubr.msk.bf16.vlgmr.msra.gmra.mrb[0].mxu1 %vm191_vm4, %v167_v53 }
 0x1c7   :  { %v229_v9 = vpop.f32.mrb[0].mxu1 }
 0x1c8   :  { %v230_v11 = vadd.f32 %v290_v7, %v229_v9  ;;  %v323_v12 = vpop.f32.mrb[1].mxu1 }
 0x1c9   :  { %v232_v13 = vpop.f32.mrb[2].mxu1 }
 0x1ca   :  { %v236_v15 = vmax.f32 %v230_v11, 0.0  ;;  %v233_v16 = vadd.f32 %v290_v7, %v232_v13  ;;  %v324_v17 = vpop.f32.mrb[3].mxu1 }
 0x1cc   :  { %v260_v18 = vadd.f32 %v236_v15, %v236_v15  ;;  %v237_v19 = vmax.f32 %v233_v16, 0.0 }
 0x1ce   :  { %v262_v20 = vsel %vm258_vm5, %v260_v18, 0.0  ;;  %v261_v21 = vadd.f32 %v237_v19, %v237_v19 }
 0x1cf   :  { %264 = vst.msk [vmem:[#allocation4] sm:$0xff] %vm191_vm4, %v262_v20 }
 0x1d0   :  { %v263_v22 = vsel %vm259_vm6, %v261_v21, 0.0 }
 0x1d1   :  { %265 = vst.msk [vmem:[#allocation4 + $0x8] sm:$0xff] %vm191_vm4, %v263_v22 }
 0x1d2   :  { %349 = shalt.err (!%p346_p4)
}
 0x1d3   :  { %s350_s19 = scalar_lea.hbm %s456_s6, 256 }
 0x1d4   :  { %p351_p5 = scmp.ne.s32.totalorder %s456_s6, %s350_s19  ;;  %p354_p6 = scmp.lt.u32.totalorder %s350_s19, %s456_s6 }
 0x1d6   :  { %p356_p7 = pnand %p354_p6, %p351_p5 }
 0x1d8   :  { %359 = shalt.err (!%p356_p7)
}
 0x1d9   :  { %s365_s24 = smov 128   ;;  %s366_s25 = smov 8  }
 0x1da   :  { %277 = dma.vmem_to_hbm [thread:$0]  %s272_s16, 256, %s456_s6, [#allocation5], %s365_s24, %s365_s24, %s366_s25  }
 0x1db   :  { %360 = dma.done.wait [#allocation5], 256  }
 0x1dc   :  { %361 = vsyncadd [#allocation5], 4294967040 }
 0x1dd   :  { %281 = vsyncpa [#allocation5], 1 }

</bundles_post_ra>
